<compile_context>
chip_gen: v5e
topology: v5e:2x2
jax: 0.10.0
libtpu: 0.0.40
codegen_flags: <defaults>
</compile_context>

<pallas_src>
import jax
import jax.numpy as jnp
from jax.experimental import pallas as pl
from jax.experimental.pallas import tpu as pltpu

IN_DIM, H1, H2, OUT_DIM = 12, 32, 16, 1
LANE = 128


def mlp_kernel(x_ref, w1_ref, b1_ref, w2_ref, b2_ref, w3_ref, b3_ref, o_ref):
    x = x_ref[...]                                                   # (12, tb)
    # layer1 + ReLU  -> (32, tb)
    h = jnp.dot(w1_ref[...], x, preferred_element_type=jnp.float32) + b1_ref[...]
    h = jnp.maximum(h, 0.0)
    # dropout -> identity (eval mode)
    # layer2 + ReLU  -> (16, tb)
    h = jnp.dot(w2_ref[...], h, preferred_element_type=jnp.float32) + b2_ref[...]
    h = jnp.maximum(h, 0.0)
    # dropout -> identity (eval mode)
    # layer3        -> (1, tb), lane-dense store
    o_ref[...] = (jnp.dot(w3_ref[...], h, preferred_element_type=jnp.float32)
                  + b3_ref[...]).astype(o_ref.dtype)


def mlp_forward(x, params, *, tb=2048):
    """x: (B, 12) float32 -> (B, 1) float32.

    params: (w1, b1, w2, b2, w3, b3) with PyTorch Linear layout
            w: (out_features, in_features), b: (out_features, 1).
    """
    w1, b1, w2, b2, w3, b3 = params
    B = x.shape[0]

    # Pad batch up to a multiple of 128 lanes; clamp tile to the padded batch.
    B_pad = ((max(B, LANE) + LANE - 1) // LANE) * LANE
    tb = max(LANE, min((tb // LANE) * LANE, B_pad))
    B_pad = ((B_pad + tb - 1) // tb) * tb

    # One-time transpose + zero-pad in the XLA wrapper: (B,12) -> (12, B_pad).
    xt = jnp.pad(x.T, ((0, 0), (0, B_pad - B)))

    grid = (B_pad // tb,)
    # Grid-invariant weights/biases: every step sees the full (tiny) tensor.
    full = lambda shape: pl.BlockSpec(shape, lambda i: (0, 0))

    out_t = pl.pallas_call(
        mlp_kernel,
        out_shape=jax.ShapeDtypeStruct((OUT_DIM, B_pad), jnp.float32),
        grid_spec=pltpu.PrefetchScalarGridSpec(
            num_scalar_prefetch=0,
            grid=grid,
            in_specs=[
                pl.BlockSpec((IN_DIM, tb), lambda i: (0, i)),   # x tile (12, tb)
                full((H1, IN_DIM)), full((H1, 1)),              # layer1
                full((H2, H1)),     full((H2, 1)),              # layer2
                full((OUT_DIM, H2)), full((OUT_DIM, 1)),        # layer3
            ],
            out_specs=pl.BlockSpec((OUT_DIM, tb), lambda i: (0, i)),
        ),
        compiler_params=pltpu.CompilerParams(
            dimension_semantics=("parallel",),
            vmem_limit_bytes=32 * 1024 * 1024,
        ),
    )(xt, w1, b1, w2, b2, w3, b3)

    # (1, B_pad) -> (B, 1)
    return out_t[:, :B].T


def init_params(key):
    """Deterministic PyTorch-Linear-style init: U(-1/sqrt(fan_in), 1/sqrt(fan_in)).

    Stored in PyTorch layout: weight (out, in), bias (out, 1).
    """
    ks = jax.random.split(key, 6)

    def linear(kw, kb, fan_in, fan_out):
        bound = 1.0 / jnp.sqrt(jnp.float32(fan_in))
        w = jax.random.uniform(kw, (fan_out, fan_in), jnp.float32, -bound, bound)
        b = jax.random.uniform(kb, (fan_out, 1), jnp.float32, -bound, bound)
        return w, b

    w1, b1 = linear(ks[0], ks[1], IN_DIM, H1)
    w2, b2 = linear(ks[2], ks[3], H1, H2)
    w3, b3 = linear(ks[4], ks[5], H2, OUT_DIM)
    return (w1, b1, w2, b2, w3, b3)


def mlp_reference(x, params):
    w1, b1, w2, b2, w3, b3 = params
    h = jnp.maximum(x @ w1.T + b1.T, 0.0)
    h = jnp.maximum(h @ w2.T + b2.T, 0.0)
    return h @ w3.T + b3.T


if __name__ == "__main__":
    key = jax.random.PRNGKey(0)
    kx, kp = jax.random.split(key)

    B = 200                                        # small, non-multiple-of-128 batch
    x = jax.random.normal(kx, (B, IN_DIM), jnp.float32)
    params = init_params(kp)

    out = jax.block_until_ready(mlp_forward(x, params))

    ref = mlp_reference(x, params)
    assert out.shape == (B, OUT_DIM)
    assert jnp.allclose(out, ref, atol=1e-5, rtol=1e-5), "mismatch vs reference"

    print("KERNEL_OK")
</pallas_src>

<mosaic_0001>
module attributes {stable_mosaic.version = 11 : i64} {
  func.func @mlp_kernel(%arg0: i32, %arg1: memref<12x256xf32, #tpu.memory_space<vmem>>, %arg2: memref<32x12xf32, #tpu.memory_space<vmem>>, %arg3: memref<32x1xf32, #tpu.memory_space<vmem>>, %arg4: memref<16x32xf32, #tpu.memory_space<vmem>>, %arg5: memref<16x1xf32, #tpu.memory_space<vmem>>, %arg6: memref<1x16xf32, #tpu.memory_space<vmem>>, %arg7: memref<1x1xf32, #tpu.memory_space<vmem>>, %arg8: memref<1x256xf32, #tpu.memory_space<vmem>>) attributes {dimension_semantics = [#tpu.dimension_semantics<parallel>], iteration_bounds = array<i64: 1>, scalar_prefetch = 0 : i64, scratch_operands = 0 : i64, tpu.core_type = #tpu.core_type<tc>, window_params = [{transform_indices = @transform_0, window_bounds = array<i64: 12, 256>}, {pipeline_mode = #tpu.pipeline_mode<synchronous>, transform_indices = @transform_1, window_bounds = array<i64: 32, 12>}, {pipeline_mode = #tpu.pipeline_mode<synchronous>, transform_indices = @transform_2, window_bounds = array<i64: 32, 1>}, {pipeline_mode = #tpu.pipeline_mode<synchronous>, transform_indices = @transform_3, window_bounds = array<i64: 16, 32>}, {pipeline_mode = #tpu.pipeline_mode<synchronous>, transform_indices = @transform_4, window_bounds = array<i64: 16, 1>}, {pipeline_mode = #tpu.pipeline_mode<synchronous>, transform_indices = @transform_5, window_bounds = array<i64: 1, 16>}, {pipeline_mode = #tpu.pipeline_mode<synchronous>, transform_indices = @transform_6, window_bounds = array<i64: 1, 1>}, {transform_indices = @transform_7, window_bounds = array<i64: 1, 256>}]} {
    %c0 = arith.constant 0 : index
    %c0_0 = arith.constant 0 : index
    %0 = vector.load %arg1[%c0, %c0_0] : memref<12x256xf32, #tpu.memory_space<vmem>>, vector<12x256xf32>
    %c0_1 = arith.constant 0 : index
    %c0_2 = arith.constant 0 : index
    %1 = vector.load %arg2[%c0_1, %c0_2] : memref<32x12xf32, #tpu.memory_space<vmem>>, vector<32x12xf32>
    %cst = arith.constant dense<0.000000e+00> : vector<32x256xf32>
    %2 = tpu.matmul %1, %0, %cst {dimension_numbers = #tpu.dot_dimension_numbers<[1], [0], [0], [1], [0, 0, 1, 1], [], []>} : vector<32x12xf32>, vector<12x256xf32>, vector<32x256xf32> -> vector<32x256xf32>
    %c0_3 = arith.constant 0 : index
    %c0_4 = arith.constant 0 : index
    %3 = vector.load %arg3[%c0_3, %c0_4] : memref<32x1xf32, #tpu.memory_space<vmem>>, vector<32x1xf32>
    %4 = vector.broadcast %3 : vector<32x1xf32> to vector<32x256xf32>
    %5 = arith.addf %2, %4 : vector<32x256xf32>
    %cst_5 = arith.constant 0.000000e+00 : f32
    %6 = vector.broadcast %cst_5 : f32 to vector<32x256xf32>
    %7 = arith.maximumf %5, %6 : vector<32x256xf32>
    %c0_6 = arith.constant 0 : index
    %c0_7 = arith.constant 0 : index
    %8 = vector.load %arg4[%c0_6, %c0_7] : memref<16x32xf32, #tpu.memory_space<vmem>>, vector<16x32xf32>
    %cst_8 = arith.constant dense<0.000000e+00> : vector<16x256xf32>
    %9 = tpu.matmul %8, %7, %cst_8 {dimension_numbers = #tpu.dot_dimension_numbers<[1], [0], [0], [1], [0, 0, 1, 1], [], []>} : vector<16x32xf32>, vector<32x256xf32>, vector<16x256xf32> -> vector<16x256xf32>
    %c0_9 = arith.constant 0 : index
    %c0_10 = arith.constant 0 : index
    %10 = vector.load %arg5[%c0_9, %c0_10] : memref<16x1xf32, #tpu.memory_space<vmem>>, vector<16x1xf32>
    %11 = vector.broadcast %10 : vector<16x1xf32> to vector<16x256xf32>
    %12 = arith.addf %9, %11 : vector<16x256xf32>
    %cst_11 = arith.constant 0.000000e+00 : f32
    %13 = vector.broadcast %cst_11 : f32 to vector<16x256xf32>
    %14 = arith.maximumf %12, %13 : vector<16x256xf32>
    %c0_12 = arith.constant 0 : index
    %c0_13 = arith.constant 0 : index
    %15 = vector.load %arg6[%c0_12, %c0_13] : memref<1x16xf32, #tpu.memory_space<vmem>>, vector<1x16xf32>
    %cst_14 = arith.constant dense<0.000000e+00> : vector<1x256xf32>
    %16 = tpu.matmul %15, %14, %cst_14 {dimension_numbers = #tpu.dot_dimension_numbers<[1], [0], [0], [1], [0, 0, 1, 1], [], []>} : vector<1x16xf32>, vector<16x256xf32>, vector<1x256xf32> -> vector<1x256xf32>
    %c0_15 = arith.constant 0 : index
    %c0_16 = arith.constant 0 : index
    %17 = vector.load %arg7[%c0_15, %c0_16] : memref<1x1xf32, #tpu.memory_space<vmem>>, vector<1x1xf32>
    %18 = vector.broadcast %17 : vector<1x1xf32> to vector<1x256xf32>
    %19 = arith.addf %16, %18 : vector<1x256xf32>
    %c0_17 = arith.constant 0 : index
    %c0_18 = arith.constant 0 : index
    %20 = vector.load %arg8[%c0_17, %c0_18] : memref<1x256xf32, #tpu.memory_space<vmem>>, vector<1x256xf32>
    tpu.vector_store %arg8[%c0_17, %c0_18], %19 {strides = array<i32>} : memref<1x256xf32, #tpu.memory_space<vmem>>, vector<1x256xf32>,
    return
  }
  func.func @transform_0(%arg0: i32) -> (i32, i32) {
    %c0_i32 = arith.constant 0 : i32
    %c0_i32_0 = arith.constant 0 : i32
    return %c0_i32, %arg0 : i32, i32
  }
  func.func @transform_1(%arg0: i32) -> (i32, i32) {
    %c0_i32 = arith.constant 0 : i32
    %c0_i32_0 = arith.constant 0 : i32
    %c0_i32_1 = arith.constant 0 : i32
    return %c0_i32, %c0_i32_0 : i32, i32
  }
  func.func @transform_2(%arg0: i32) -> (i32, i32) {
    %c0_i32 = arith.constant 0 : i32
    %c0_i32_0 = arith.constant 0 : i32
    %c0_i32_1 = arith.constant 0 : i32
    return %c0_i32, %c0_i32_0 : i32, i32
  }
  func.func @transform_3(%arg0: i32) -> (i32, i32) {
    %c0_i32 = arith.constant 0 : i32
    %c0_i32_0 = arith.constant 0 : i32
    %c0_i32_1 = arith.constant 0 : i32
    return %c0_i32, %c0_i32_0 : i32, i32
  }
  func.func @transform_4(%arg0: i32) -> (i32, i32) {
    %c0_i32 = arith.constant 0 : i32
    %c0_i32_0 = arith.constant 0 : i32
    %c0_i32_1 = arith.constant 0 : i32
    return %c0_i32, %c0_i32_0 : i32, i32
  }
  func.func @transform_5(%arg0: i32) -> (i32, i32) {
    %c0_i32 = arith.constant 0 : i32
    %c0_i32_0 = arith.constant 0 : i32
    %c0_i32_1 = arith.constant 0 : i32
    return %c0_i32, %c0_i32_0 : i32, i32
  }
  func.func @transform_6(%arg0: i32) -> (i32, i32) {
    %c0_i32 = arith.constant 0 : i32
    %c0_i32_0 = arith.constant 0 : i32
    %c0_i32_1 = arith.constant 0 : i32
    return %c0_i32, %c0_i32_0 : i32, i32
  }
  func.func @transform_7(%arg0: i32) -> (i32, i32) {
    %c0_i32 = arith.constant 0 : i32
    %c0_i32_0 = arith.constant 0 : i32
    return %c0_i32, %arg0 : i32, i32
  }
}

</mosaic_0001>

<bundles_post_ra>
// kernel: tpu_custom_call.1
= control target key start
LH: loop header
LB: loop body
LE: loop exit
PB: predicated region body
PF: predicated region fallthrough
CT: control target
= control target key end

     0   :  { %s451_s0 = inlined_call_operand.vmem [shape: f32[12,256], index: 0, kind: input, shape index: {}]   ;;  %s452_s1 = inlined_call_operand.vmem [shape: f32[32,12], index: 1, kind: input, shape index: {}]   ;;  %s453_s2 = inlined_call_operand.vmem [shape: f32[32,1], index: 2, kind: input, shape index: {}]   ;;  %s454_s3 = inlined_call_operand.vmem [shape: f32[16,32], index: 3, kind: input, shape index: {}]   ;;  %s455_s4 = inlined_call_operand.vmem [shape: f32[16,1], index: 4, kind: input, shape index: {}]   ;;  %s456_s5 = inlined_call_operand.vmem [shape: f32[1,16], index: 5, kind: input, shape index: {}]   ;;  %s457_s6 = inlined_call_operand.<no memory space> [shape: f32[1,1], index: 6, kind: input, shape index: {}]   ;;  %s458_s7 = inlined_call_operand.hbm [shape: f32[1,256], index: 7, kind: output, shape index: {}]  }
   0x1   :  { %v12_v0 = vstv %s457_s6 }
   0x2   :  { %13 = vst [vmem:[#allocation2] sm:$0x1] %v12_v0 }
   0x3   :  { %v31_v1 = vld [vmem:[%s451_s0 + $0x10] sm:$0xf]  ;;  %vm74_vm0 = vcmask 1043456   ;;  %v32_v2 = vld [vmem:[%s451_s0 + $0x18] sm:$0xf]  ;;  %v29_v3 = vld [vmem:[%s451_s0] sm:$0xff] }
   0x4   :  { %297 = vmatpush.msk.msra.mxu0 %vm74_vm0, %v31_v1  ;;  %302 = vmatpush.msk.msra.mxu1 %vm74_vm0, %v32_v2  ;;  %v30_v4 = vld [vmem:[%s451_s0 + $0x8] sm:$0xff]  ;;  %v33_v5 = vld [vmem:[%s452_s1] sm:$0xff]  ;;  %vm61_vm1 = vcmask 97280   ;;  %v344_v6 = vmov 0   ;;  %v40_v8 = vld [vmem:[%s453_s2 + $0x18] sm:$0xff] }
   0x5   :  { %316 = vset.pattern.permute.xlu1 %v344_v6  ;;  %v38_v7 = vld [vmem:[%s453_s2 + $0x8] sm:$0xff]  ;;  %315 = vset.pattern.permute.xlu0 %v344_v6 }
   0x6   :  { %96 = vmatpush.msra.mxu0 %v29_v3  ;;  %125 = vmatpush.msra.mxu1 %v30_v4 }
   0x7   :  { %298 = vmatmul.msk.f32.vlgmr.msra.gmra.mxu0 %vm61_vm1, %v33_v5  ;;  %303 = vmatmul.msk.f32.vlgmr.msra.gmra.mxu1 %vm61_vm1, %v33_v5 }
   0x8   :  { %14 = vsyncpa [#allocation4], 0  ;;  %48 = vperm.xlu1 %316, %v38_v7   ;;  %58 = vperm.xlu0 %315, %v40_v8   ;;  %v34_v9 = vld [vmem:[%s452_s1 + $0x8] sm:$0xff]  ;;  %v37_v10 = vld [vmem:[%s453_s2] sm:$0xff]  ;;  %vm161_vm2 = vcmask 261120   ;;  %vm226_vm3 = vcmask 130048   ;;  %v276_v0 = vlaneseq }
   0x9   :  { %317 = vset.pattern.permute.xlu2 %v344_v6  ;;  %v39_v11 = vld [vmem:[%s453_s2 + $0x10] sm:$0xff]  ;;  %v219_v13 = vld [vmem:[#allocation2] sm:$0x1]  ;;  %v36_v14 = vld [vmem:[%s452_s1 + $0x18] sm:$0xff]  ;;  %s345_s8 = smov [#allocation3]   ;;  %s288_s11 = sshll.u32 %s458_s7, 4  ;;  %s289_s11 = int_to_ptr.hbm [resolvable:$true] %s288_s11 }
   0xa   :  { %v35_v12 = vld [vmem:[%s452_s1 + $0x10] sm:$0xff]  ;;  %v150_v19 = vld [vmem:[%s455_s4 + $0x8] sm:$0xff]  ;;  %v149_v24 = vld [vmem:[%s455_s4] sm:$0xff]  ;;  %s286_s9 = sshll.u32 %s345_s8, 4  ;;  %vm273_vm4 = vcmask 1040384   ;;  %vm278_vm5 = vcmp.lt.s32.totalorder %v276_v0, 256  ;;  %s287_s9 = int_to_ptr.vmem [resolvable:$true] %s286_s9 }
   0xb   :  { %158 = vperm.xlu2 %317, %v150_v19   ;;  %v147_v45 = vld [vmem:[%s454_s3] sm:$0xff]  ;;  %v148_v46 = vld [vmem:[%s454_s3 + $0x8] sm:$0xff] }
   0xc   :  { %v218_v61 = vld [vmem:[%s456_s5] sm:$0x1] }
   0xf   :  { %299 = vmatmul.msk.f32.gmra.mxu0 %vm61_vm1, %v34_v9  ;;  %304 = vmatmul.msk.f32.gmra.mxu1 %vm61_vm1, %v34_v9 }
  0x10   :  { %43 = vperm.xlu1 %316, %v37_v10   ;;  %53 = vperm.xlu0 %315, %v39_v11  }
  0x13   :  { %153 = vperm.xlu2 %317, %v149_v24  }
  0x17   :  { %300 = vmatmul.msk.f32.gmra.mxu0 %vm61_vm1, %v35_v12  ;;  %305 = vmatmul.msk.f32.gmra.mxu1 %vm61_vm1, %v35_v12 }
  0x18   :  { %222 = vperm.xlu0 %315, %v219_v13  }
  0x1f   :  { %301 = vmatmul.msk.f32.gmra.mxu0 %vm61_vm1, %v36_v14  ;;  %306 = vmatmul.msk.f32.gmra.mxu1 %vm61_vm1, %v36_v14 }
  0x65   :  { %v159_v47 = vpop.permute.xlu2 %158 }
  0x6d   :  { %v154_v50 = vpop.permute.xlu2 %153 }
  0x7a   :  { %v59_v20 = vpop.permute.xlu0 %58  ;;  %v49_v21 = vpop.permute.xlu1 %48 }
  0x82   :  { %v54_v25 = vpop.permute.xlu0 %53  ;;  %v44_v32 = vpop.permute.xlu1 %43 }
  0x84   :  { %v98_v15 = vpop.f32.mrf.mxu0  ;;  %v127_v16 = vpop.f32.mrf.mxu1 }
  0x85   :  { %v99_v37 = vadd.f32 %v98_v15, %v44_v32  ;;  %v128_v38 = vadd.f32 %v127_v16, %v44_v32 }
  0x87   :  { %v139_v43 = vmax.f32 %v99_v37, 0.0  ;;  %v140_v44 = vmax.f32 %v128_v38, 0.0 }
  0x8a   :  { %v223_v62 = vpop.permute.xlu0 %222 }
  0x8b   :  { %v225_v63 = vperm.slane %v223_v62, 0 }
  0x8c   :  { %v101_v17 = vpop.f32.mrf.mxu0  ;;  %v130_v18 = vpop.f32.mrf.mxu1 }
  0x8d   :  { %v102_v33 = vadd.f32 %v101_v17, %v49_v21  ;;  %v131_v34 = vadd.f32 %v130_v18, %v49_v21 }
  0x8f   :  { %v141_v41 = vmax.f32 %v102_v33, 0.0  ;;  %v142_v42 = vmax.f32 %v131_v34, 0.0 }
  0x94   :  { %v104_v22 = vpop.f32.mrf.mxu0  ;;  %v133_v23 = vpop.f32.mrf.mxu1 }
  0x95   :  { %v105_v28 = vadd.f32 %v104_v22, %v54_v25  ;;  %v134_v29 = vadd.f32 %v133_v23, %v54_v25 }
  0x97   :  { %v143_v39 = vmax.f32 %v105_v28, 0.0  ;;  %v144_v40 = vmax.f32 %v134_v29, 0.0 }
  0x9c   :  { %v107_v26 = vpop.f32.mrf.mxu0  ;;  %v136_v27 = vpop.f32.mrf.mxu1 }
  0x9d   :  { %v108_v30 = vadd.f32 %v107_v26, %v59_v20  ;;  %v137_v31 = vadd.f32 %v136_v27, %v59_v20 }
  0x9f   :  { %v145_v35 = vmax.f32 %v108_v30, 0.0  ;;  %v146_v36 = vmax.f32 %v137_v31, 0.0 }
  0xa1   :  { %180 = vmatpush.msra.mxu2 %v145_v35  ;;  %203 = vmatpush.msra.mxu3 %v146_v36 }
  0xa3   :  { %181 = vmatpush.msra.mxu2 %v143_v39  ;;  %204 = vmatpush.msra.mxu3 %v144_v40 }
  0xa5   :  { %182 = vmatpush.msra.mxu2 %v141_v41  ;;  %205 = vmatpush.msra.mxu3 %v142_v42 }
  0xa7   :  { %183 = vmatpush.msra.mxu2 %v139_v43  ;;  %206 = vmatpush.msra.mxu3 %v140_v44 }
  0xa8   :  { %307 = vmatmul.msk.f32.vlgmr.msra.gmra.mxu2 %vm161_vm2, %v147_v45  ;;  %309 = vmatmul.msk.f32.vlgmr.msra.gmra.mxu3 %vm161_vm2, %v147_v45 }
  0xb0   :  { %308 = vmatmul.msk.f32.gmra.mxu2 %vm161_vm2, %v148_v46  ;;  %310 = vmatmul.msk.f32.gmra.mxu3 %vm161_vm2, %v148_v46 }
 0x12b   :  { %v185_v48 = vpop.f32.mrf.mxu2  ;;  %v208_v49 = vpop.f32.mrf.mxu3 }
 0x12c   :  { %v186_v53 = vadd.f32 %v185_v48, %v154_v50  ;;  %v209_v54 = vadd.f32 %v208_v49, %v154_v50 }
 0x12e   :  { %v214_v59 = vmax.f32 %v186_v53, 0.0  ;;  %v215_v60 = vmax.f32 %v209_v54, 0.0 }
 0x133   :  { %v188_v51 = vpop.f32.mrf.mxu2  ;;  %v211_v52 = vpop.f32.mrf.mxu3 }
 0x134   :  { %v189_v55 = vadd.f32 %v188_v51, %v159_v47  ;;  %v212_v56 = vadd.f32 %v211_v52, %v159_v47 }
 0x136   :  { %v216_v57 = vmax.f32 %v189_v55, 0.0  ;;  %v217_v58 = vmax.f32 %v212_v56, 0.0 }
 0x138   :  { %244 = vmatpush.msrb.mxu2 %v216_v57  ;;  %264 = vmatpush.msrb.mxu3 %v217_v58 }
 0x13a   :  { %245 = vmatpush.msrb.mxu2 %v214_v59  ;;  %265 = vmatpush.msrb.mxu3 %v215_v60 }
 0x13b   :  { %311 = vmatmul.msk.f32.vlgmr.msrb.gmra.mxu2 %vm226_vm3, %v218_v61  ;;  %312 = vmatmul.msk.f32.vlgmr.msrb.gmra.mxu3 %vm226_vm3, %v218_v61 }
 0x1be   :  { %v247_v1 = vpop.f32.mrf.mxu2  ;;  %v267_v2 = vpop.f32.mrf.mxu3 }
 0x1bf   :  { %v268_v3 = vadd.f32 %v267_v2, %v225_v63  ;;  %v248_v4 = vadd.f32 %v247_v1, %v225_v63 }
 0x1c1   :  { %v272_v5 = vrot.slane %v268_v3, 7 }
 0x1c3   :  { %v274_v6 = vsel %vm273_vm4, %v248_v4, %v272_v5 }
 0x1c4   :  { %280 = vst.msk [vmem:[#allocation3] sm:$0x3] %vm278_vm5, %v274_v6 }
 0x1c5   :  { %291 = dma.vmem_to_hbm [thread:$0]  %s287_s9, 32, %s289_s11, [#allocation4]  }
 0x1c6   :  { %342 = dma.done.wait [#allocation4], 32  }
 0x1c7   :  { %343 = vsyncadd [#allocation4], 4294967264 }
 0x1c8   :  { %296 = vsyncpa [#allocation4], 1 }

</bundles_post_ra>
